<compile_context>
chip_gen: v7x
topology: tpu7x:2x2x1
jax: 0.10.0
libtpu: 0.0.40
codegen_flags: <defaults>
</compile_context>

<pallas_src>
import functools

import jax
import jax.numpy as jnp
from jax.experimental import pallas as pl
from jax.experimental.pallas import tpu as pltpu


def temporal_aware_block_kernel(x_ref, w1_ref, w2_ref, bn_ref, out_ref,
                                pad_ref, stk_ref, *, T, K, C, B, dilation):
    """Whole batch in one grid step.

    x_ref   : (B, T, C)        input (unpadded, original layout)
    w1/w2   : (K*B*C, B*C)     block-diagonal im2col conv weights
    bn_ref  : (4, B*C)         rows = [scale1, shift1, scale2, shift2]
    out_ref : (B, T, C)
    pad_ref : (T+P, B*C) VMEM  causal-padded, batch-lane-packed activations
    stk_ref : (T, K*B*C) VMEM  im2col tap-stacked matmul operand
    """
    P = (K - 1) * dilation
    BC = B * C

    # Zero the causal left-pad rows once; they stay zero for both convs.
    if P > 0:
        pad_ref[0:P, :] = jnp.zeros((P, BC), jnp.float32)

    # Pack the batch into the lane dimension: pad[P + t, b*C + c] = x[b, t, c].
    xs = []
    for b in range(B):
        xb = x_ref[b].astype(jnp.float32)                       # (T, C)
        xs.append(xb)
        pad_ref[P:P + T, b * C:(b + 1) * C] = xb

    def conv_bn_relu(w_ref, s_row, t_row):
        # im2col: stack the K dilated taps along the contraction axis, then a
        # single MXU matmul covers all taps and the whole batch at once.
        for k in range(K):
            stk_ref[:, k * BC:(k + 1) * BC] = \
                pad_ref[k * dilation:k * dilation + T, :]
        y = jnp.dot(stk_ref[...], w_ref[...],
                    preferred_element_type=jnp.float32)         # (T, B*C)
        # folded conv-bias + BatchNorm (eval) + relu
        return jnp.maximum(
            y * bn_ref[s_row:s_row + 1, :] + bn_ref[t_row:t_row + 1, :], 0.0)

    a1 = conv_bn_relu(w1_ref, 0, 1)          # conv1 -> bn1 -> relu
    pad_ref[P:P + T, :] = a1                 # reuse padded scratch (rows :P stay 0)
    a2 = conv_bn_relu(w2_ref, 2, 3)          # conv2 -> bn2 -> relu

    # gating: F_x = original_x * sigmoid(a2)
    gate = jax.nn.sigmoid(a2)                # (T, B*C)
    for b in range(B):
        out_ref[b] = (xs[b] * gate[:, b * C:(b + 1) * C]).astype(out_ref.dtype)


def _fold_bn(bias, gamma, beta, mean, var, eps=1e-5):
    scale = gamma / jnp.sqrt(var + eps)
    shift = (bias - mean) * scale + beta
    return scale, shift


def _im2col_blockdiag(w, B):
    """(K, Cin, Cout) conv taps -> (K*B*Cin, B*Cout) block-diagonal im2col weight.

    Row index  = k*B*Cin + b*Cin + i  (matches the tap-stacked operand layout).
    Col index  = b*Cout + o           (matches the batch-lane-packed activations).
    """
    K, Cin, Cout = w.shape
    eye = jnp.eye(B, dtype=w.dtype)
    big = jnp.einsum('kio,bc->kbico', w, eye)        # (K, B, Cin, B, Cout)
    return big.reshape(K * B * Cin, B * Cout)


def temporal_aware_block(x, params, kernel_size, dilation):
    """x: (B, T, C) float32. params: conv/bn params (see __main__)."""
    B, T, C = x.shape
    K = kernel_size
    P = (K - 1) * dilation
    BC = B * C
    (w1, b1, g1, be1, m1, v1,
     w2, b2, g2, be2, m2, v2) = params

    # Parameter-only transforms (constant-folded under jit; not on the data path).
    s1, t1 = _fold_bn(b1, g1, be1, m1, v1)
    s2, t2 = _fold_bn(b2, g2, be2, m2, v2)
    bn = jnp.stack([jnp.tile(s1, B), jnp.tile(t1, B),
                    jnp.tile(s2, B), jnp.tile(t2, B)], axis=0).astype(jnp.float32)
    w1_big = _im2col_blockdiag(w1.astype(jnp.float32), B)        # (K*BC, BC)
    w2_big = _im2col_blockdiag(w2.astype(jnp.float32), B)

    kern = functools.partial(temporal_aware_block_kernel,
                             T=T, K=K, C=C, B=B, dilation=dilation)
    return pl.pallas_call(
        kern,
        out_shape=jax.ShapeDtypeStruct((B, T, C), x.dtype),
        grid=(1,),
        in_specs=[
            pl.BlockSpec((B, T, C), lambda i: (0, 0, 0)),        # input x
            pl.BlockSpec((K * BC, BC), lambda i: (0, 0)),        # conv1 weight
            pl.BlockSpec((K * BC, BC), lambda i: (0, 0)),        # conv2 weight
            pl.BlockSpec((4, BC), lambda i: (0, 0)),             # folded BN table
        ],
        out_specs=pl.BlockSpec((B, T, C), lambda i: (0, 0, 0)),
        scratch_shapes=[
            pltpu.VMEM((T + P, BC), jnp.float32),                # padded activations
            pltpu.VMEM((T, K * BC), jnp.float32),                # im2col operand
        ],
        compiler_params=pltpu.CompilerParams(
            dimension_semantics=("arbitrary",)),
    )(x, w1_big, w2_big, bn)


# ---------------- pure-JAX reference (for correctness check) ----------------
def _causal_conv_ref(x, w, b, dilation):
    B, T, C = x.shape
    K = w.shape[0]
    P = (K - 1) * dilation
    xp = jnp.pad(x, ((0, 0), (P, 0), (0, 0)))
    y = jnp.zeros((B, T, C), jnp.float32)
    for k in range(K):
        y = y + jnp.einsum('bti,io->bto',
                           xp[:, k * dilation: k * dilation + T, :], w[k])
    return y + b.reshape(1, 1, C)


def temporal_aware_block_ref(x, params, K, dilation, eps=1e-5):
    (w1, b1, g1, be1, m1, v1, w2, b2, g2, be2, m2, v2) = params
    original_x = x
    h = _causal_conv_ref(x, w1, b1, dilation)
    h = (h - m1) / jnp.sqrt(v1 + eps) * g1 + be1
    h = jnp.maximum(h, 0.0)
    h = _causal_conv_ref(h, w2, b2, dilation)
    h = (h - m2) / jnp.sqrt(v2 + eps) * g2 + be2
    h = jnp.maximum(h, 0.0)
    return original_x * jax.nn.sigmoid(h)


if __name__ == "__main__":
    B, T, C = 2, 16, 32          # batch, sequence length, nb_filters
    K, dilation = 3, 2           # kernel_size, dilation_rate

    key = jax.random.PRNGKey(0)
    ks = jax.random.split(key, 13)
    x = jax.random.normal(ks[0], (B, T, C), jnp.float32)

    # conv1 / bn1 parameters  (torch Conv1d weight (Cout,Cin,K) stored as (K,Cin,Cout))
    w1 = 0.1 * jax.random.normal(ks[1], (K, C, C), jnp.float32)
    b1 = 0.1 * jax.random.normal(ks[2], (C,), jnp.float32)
    g1 = 1.0 + 0.1 * jax.random.normal(ks[3], (C,), jnp.float32)
    be1 = 0.1 * jax.random.normal(ks[4], (C,), jnp.float32)
    m1 = 0.1 * jax.random.normal(ks[5], (C,), jnp.float32)
    v1 = 0.5 + jnp.abs(jax.random.normal(ks[6], (C,), jnp.float32))

    # conv2 / bn2 parameters
    w2 = 0.1 * jax.random.normal(ks[7], (K, C, C), jnp.float32)
    b2 = 0.1 * jax.random.normal(ks[8], (C,), jnp.float32)
    g2 = 1.0 + 0.1 * jax.random.normal(ks[9], (C,), jnp.float32)
    be2 = 0.1 * jax.random.normal(ks[10], (C,), jnp.float32)
    m2 = 0.1 * jax.random.normal(ks[11], (C,), jnp.float32)
    v2 = 0.5 + jnp.abs(jax.random.normal(ks[12], (C,), jnp.float32))

    params = (w1, b1, g1, be1, m1, v1, w2, b2, g2, be2, m2, v2)

    out = temporal_aware_block(x, params, K, dilation)
    out = jax.block_until_ready(out)

    ref = temporal_aware_block_ref(x, params, K, dilation)
    assert out.shape == (B, T, C)
    assert jnp.allclose(out, ref, atol=1e-5, rtol=1e-5), "mismatch vs reference"

    print("KERNEL_OK")
</pallas_src>

<mosaic_0001>
module attributes {stable_mosaic.version = 11 : i64} {
  func.func @temporal_aware_block_kernel(%arg0: i32, %arg1: memref<2x16x32xf32, #tpu.memory_space<vmem>>, %arg2: memref<192x64xf32, #tpu.memory_space<vmem>>, %arg3: memref<192x64xf32, #tpu.memory_space<vmem>>, %arg4: memref<4x64xf32, #tpu.memory_space<vmem>>, %arg5: memref<2x16x32xf32, #tpu.memory_space<vmem>>, %arg6: memref<20x64xf32, #tpu.memory_space<vmem>>, %arg7: memref<16x192xf32, #tpu.memory_space<vmem>>) attributes {dimension_semantics = [#tpu.dimension_semantics<arbitrary>], iteration_bounds = array<i64: 1>, scalar_prefetch = 0 : i64, scratch_operands = 2 : i64, tpu.core_type = #tpu.core_type<tc>, window_params = [{pipeline_mode = #tpu.pipeline_mode<synchronous>, transform_indices = @transform_0, window_bounds = array<i64: 2, 16, 32>}, {pipeline_mode = #tpu.pipeline_mode<synchronous>, transform_indices = @transform_1, window_bounds = array<i64: 192, 64>}, {pipeline_mode = #tpu.pipeline_mode<synchronous>, transform_indices = @transform_2, window_bounds = array<i64: 192, 64>}, {pipeline_mode = #tpu.pipeline_mode<synchronous>, transform_indices = @transform_3, window_bounds = array<i64: 4, 64>}, {pipeline_mode = #tpu.pipeline_mode<synchronous>, transform_indices = @transform_4, window_bounds = array<i64: 2, 16, 32>}]} {
    %cst = arith.constant 0.000000e+00 : f32
    %0 = vector.broadcast %cst : f32 to vector<4x64xf32>
    %c0 = arith.constant 0 : index
    %c0_0 = arith.constant 0 : index
    %1 = vector.load %arg6[%c0, %c0_0] : memref<20x64xf32, #tpu.memory_space<vmem>>, vector<4x64xf32>
    tpu.vector_store %arg6[%c0, %c0_0], %0 {strides = array<i32>} : memref<20x64xf32, #tpu.memory_space<vmem>>, vector<4x64xf32>,
    %c0_1 = arith.constant 0 : index
    %c0_2 = arith.constant 0 : index
    %c0_3 = arith.constant 0 : index
    %2 = vector.load %arg1[%c0_1, %c0_2, %c0_3] : memref<2x16x32xf32, #tpu.memory_space<vmem>>, vector<1x16x32xf32>
    %3 = vector.shape_cast %2 : vector<1x16x32xf32> to vector<16x32xf32>
    %c4 = arith.constant 4 : index
    %c0_4 = arith.constant 0 : index
    %4 = vector.load %arg6[%c4, %c0_4] : memref<20x64xf32, #tpu.memory_space<vmem>>, vector<16x32xf32>
    tpu.vector_store %arg6[%c4, %c0_4], %3 {strides = array<i32>} : memref<20x64xf32, #tpu.memory_space<vmem>>, vector<16x32xf32>,
    %c1 = arith.constant 1 : index
    %c0_5 = arith.constant 0 : index
    %c0_6 = arith.constant 0 : index
    %5 = vector.load %arg1[%c1, %c0_5, %c0_6] : memref<2x16x32xf32, #tpu.memory_space<vmem>>, vector<1x16x32xf32>
    %6 = vector.shape_cast %5 : vector<1x16x32xf32> to vector<16x32xf32>
    %c4_7 = arith.constant 4 : index
    %c32 = arith.constant 32 : index
    %7 = vector.load %arg6[%c4_7, %c32] : memref<20x64xf32, #tpu.memory_space<vmem>>, vector<16x32xf32>
    tpu.vector_store %arg6[%c4_7, %c32], %6 {strides = array<i32>} : memref<20x64xf32, #tpu.memory_space<vmem>>, vector<16x32xf32>,
    %c0_8 = arith.constant 0 : index
    %c0_9 = arith.constant 0 : index
    %8 = vector.load %arg6[%c0_8, %c0_9] : memref<20x64xf32, #tpu.memory_space<vmem>>, vector<16x64xf32>
    %c0_10 = arith.constant 0 : index
    %c0_11 = arith.constant 0 : index
    %9 = vector.load %arg7[%c0_10, %c0_11] : memref<16x192xf32, #tpu.memory_space<vmem>>, vector<16x64xf32>
    tpu.vector_store %arg7[%c0_10, %c0_11], %8 {strides = array<i32>} : memref<16x192xf32, #tpu.memory_space<vmem>>, vector<16x64xf32>,
    %c2 = arith.constant 2 : index
    %c0_12 = arith.constant 0 : index
    %10 = vector.load %arg6[%c2, %c0_12] : memref<20x64xf32, #tpu.memory_space<vmem>>, vector<16x64xf32>
    %c0_13 = arith.constant 0 : index
    %c64 = arith.constant 64 : index
    %11 = vector.load %arg7[%c0_13, %c64] : memref<16x192xf32, #tpu.memory_space<vmem>>, vector<16x64xf32>
    tpu.vector_store %arg7[%c0_13, %c64], %10 {strides = array<i32>} : memref<16x192xf32, #tpu.memory_space<vmem>>, vector<16x64xf32>,
    %c4_14 = arith.constant 4 : index
    %c0_15 = arith.constant 0 : index
    %12 = vector.load %arg6[%c4_14, %c0_15] : memref<20x64xf32, #tpu.memory_space<vmem>>, vector<16x64xf32>
    %c0_16 = arith.constant 0 : index
    %c128 = arith.constant 128 : index
    %13 = vector.load %arg7[%c0_16, %c128] : memref<16x192xf32, #tpu.memory_space<vmem>>, vector<16x64xf32>
    tpu.vector_store %arg7[%c0_16, %c128], %12 {strides = array<i32>} : memref<16x192xf32, #tpu.memory_space<vmem>>, vector<16x64xf32>,
    %c0_17 = arith.constant 0 : index
    %c0_18 = arith.constant 0 : index
    %14 = vector.load %arg7[%c0_17, %c0_18] : memref<16x192xf32, #tpu.memory_space<vmem>>, vector<16x192xf32>
    %c0_19 = arith.constant 0 : index
    %c0_20 = arith.constant 0 : index
    %15 = vector.load %arg2[%c0_19, %c0_20] : memref<192x64xf32, #tpu.memory_space<vmem>>, vector<192x64xf32>
    %cst_21 = arith.constant dense<0.000000e+00> : vector<16x64xf32>
    %16 = tpu.matmul %14, %15, %cst_21 {dimension_numbers = #tpu.dot_dimension_numbers<[1], [0], [0], [1], [0, 0, 1, 1], [], []>} : vector<16x192xf32>, vector<192x64xf32>, vector<16x64xf32> -> vector<16x64xf32>
    %c0_22 = arith.constant 0 : index
    %c0_23 = arith.constant 0 : index
    %17 = vector.load %arg4[%c0_22, %c0_23] : memref<4x64xf32, #tpu.memory_space<vmem>>, vector<1x64xf32>
    %18 = vector.broadcast %17 : vector<1x64xf32> to vector<16x64xf32>
    %19 = arith.mulf %16, %18 : vector<16x64xf32>
    %c1_24 = arith.constant 1 : index
    %c0_25 = arith.constant 0 : index
    %20 = vector.load %arg4[%c1_24, %c0_25] : memref<4x64xf32, #tpu.memory_space<vmem>>, vector<1x64xf32>
    %21 = vector.broadcast %20 : vector<1x64xf32> to vector<16x64xf32>
    %22 = arith.addf %19, %21 : vector<16x64xf32>
    %cst_26 = arith.constant 0.000000e+00 : f32
    %23 = vector.broadcast %cst_26 : f32 to vector<16x64xf32>
    %24 = arith.maximumf %22, %23 : vector<16x64xf32>
    %c4_27 = arith.constant 4 : index
    %c0_28 = arith.constant 0 : index
    %25 = vector.load %arg6[%c4_27, %c0_28] : memref<20x64xf32, #tpu.memory_space<vmem>>, vector<16x64xf32>
    tpu.vector_store %arg6[%c4_27, %c0_28], %24 {strides = array<i32>} : memref<20x64xf32, #tpu.memory_space<vmem>>, vector<16x64xf32>,
    %c0_29 = arith.constant 0 : index
    %c0_30 = arith.constant 0 : index
    %26 = vector.load %arg6[%c0_29, %c0_30] : memref<20x64xf32, #tpu.memory_space<vmem>>, vector<16x64xf32>
    %c0_31 = arith.constant 0 : index
    %c0_32 = arith.constant 0 : index
    %27 = vector.load %arg7[%c0_31, %c0_32] : memref<16x192xf32, #tpu.memory_space<vmem>>, vector<16x64xf32>
    tpu.vector_store %arg7[%c0_31, %c0_32], %26 {strides = array<i32>} : memref<16x192xf32, #tpu.memory_space<vmem>>, vector<16x64xf32>,
    %c2_33 = arith.constant 2 : index
    %c0_34 = arith.constant 0 : index
    %28 = vector.load %arg6[%c2_33, %c0_34] : memref<20x64xf32, #tpu.memory_space<vmem>>, vector<16x64xf32>
    %c0_35 = arith.constant 0 : index
    %c64_36 = arith.constant 64 : index
    %29 = vector.load %arg7[%c0_35, %c64_36] : memref<16x192xf32, #tpu.memory_space<vmem>>, vector<16x64xf32>
    tpu.vector_store %arg7[%c0_35, %c64_36], %28 {strides = array<i32>} : memref<16x192xf32, #tpu.memory_space<vmem>>, vector<16x64xf32>,
    %c4_37 = arith.constant 4 : index
    %c0_38 = arith.constant 0 : index
    %30 = vector.load %arg6[%c4_37, %c0_38] : memref<20x64xf32, #tpu.memory_space<vmem>>, vector<16x64xf32>
    %c0_39 = arith.constant 0 : index
    %c128_40 = arith.constant 128 : index
    %31 = vector.load %arg7[%c0_39, %c128_40] : memref<16x192xf32, #tpu.memory_space<vmem>>, vector<16x64xf32>
    tpu.vector_store %arg7[%c0_39, %c128_40], %30 {strides = array<i32>} : memref<16x192xf32, #tpu.memory_space<vmem>>, vector<16x64xf32>,
    %c0_41 = arith.constant 0 : index
    %c0_42 = arith.constant 0 : index
    %32 = vector.load %arg7[%c0_41, %c0_42] : memref<16x192xf32, #tpu.memory_space<vmem>>, vector<16x192xf32>
    %c0_43 = arith.constant 0 : index
    %c0_44 = arith.constant 0 : index
    %33 = vector.load %arg3[%c0_43, %c0_44] : memref<192x64xf32, #tpu.memory_space<vmem>>, vector<192x64xf32>
    %cst_45 = arith.constant dense<0.000000e+00> : vector<16x64xf32>
    %34 = tpu.matmul %32, %33, %cst_45 {dimension_numbers = #tpu.dot_dimension_numbers<[1], [0], [0], [1], [0, 0, 1, 1], [], []>} : vector<16x192xf32>, vector<192x64xf32>, vector<16x64xf32> -> vector<16x64xf32>
    %c2_46 = arith.constant 2 : index
    %c0_47 = arith.constant 0 : index
    %35 = vector.load %arg4[%c2_46, %c0_47] : memref<4x64xf32, #tpu.memory_space<vmem>>, vector<1x64xf32>
    %36 = vector.broadcast %35 : vector<1x64xf32> to vector<16x64xf32>
    %37 = arith.mulf %34, %36 : vector<16x64xf32>
    %c3 = arith.constant 3 : index
    %c0_48 = arith.constant 0 : index
    %38 = vector.load %arg4[%c3, %c0_48] : memref<4x64xf32, #tpu.memory_space<vmem>>, vector<1x64xf32>
    %39 = vector.broadcast %38 : vector<1x64xf32> to vector<16x64xf32>
    %40 = arith.addf %37, %39 : vector<16x64xf32>
    %cst_49 = arith.constant 0.000000e+00 : f32
    %41 = vector.broadcast %cst_49 : f32 to vector<16x64xf32>
    %42 = arith.maximumf %40, %41 : vector<16x64xf32>
    %43 = arith.negf %42 : vector<16x64xf32>
    %44 = math.exp %43 : vector<16x64xf32>
    %cst_50 = arith.constant 1.000000e+00 : f32
    %45 = vector.broadcast %cst_50 : f32 to vector<16x64xf32>
    %46 = arith.addf %45, %44 : vector<16x64xf32>
    %47 = arith.divf %45, %46 : vector<16x64xf32>
    %48 = vector.extract_strided_slice %47 {offsets = [0, 0], sizes = [16, 32], strides = [1, 1]} : vector<16x64xf32> to vector<16x32xf32>
    %49 = arith.mulf %3, %48 : vector<16x32xf32>
    %c0_51 = arith.constant 0 : index
    %c0_52 = arith.constant 0 : index
    %c0_53 = arith.constant 0 : index
    %50 = vector.load %arg5[%c0_51, %c0_52, %c0_53] : memref<2x16x32xf32, #tpu.memory_space<vmem>>, vector<1x16x32xf32>
    %51 = vector.shape_cast %50 : vector<1x16x32xf32> to vector<16x32xf32>
    %52 = vector.shape_cast %49 : vector<16x32xf32> to vector<1x16x32xf32>
    tpu.vector_store %arg5[%c0_51, %c0_52, %c0_53], %52 {strides = array<i32>} : memref<2x16x32xf32, #tpu.memory_space<vmem>>, vector<1x16x32xf32>,
    %53 = vector.extract_strided_slice %47 {offsets = [0, 32], sizes = [16, 32], strides = [1, 1]} : vector<16x64xf32> to vector<16x32xf32>
    %54 = arith.mulf %6, %53 : vector<16x32xf32>
    %c1_54 = arith.constant 1 : index
    %c0_55 = arith.constant 0 : index
    %c0_56 = arith.constant 0 : index
    %55 = vector.load %arg5[%c1_54, %c0_55, %c0_56] : memref<2x16x32xf32, #tpu.memory_space<vmem>>, vector<1x16x32xf32>
    %56 = vector.shape_cast %55 : vector<1x16x32xf32> to vector<16x32xf32>
    %57 = vector.shape_cast %54 : vector<16x32xf32> to vector<1x16x32xf32>
    tpu.vector_store %arg5[%c1_54, %c0_55, %c0_56], %57 {strides = array<i32>} : memref<2x16x32xf32, #tpu.memory_space<vmem>>, vector<1x16x32xf32>,
    return
  }
  func.func @transform_0(%arg0: i32) -> (i32, i32, i32) {
    %c0_i32 = arith.constant 0 : i32
    %c0_i32_0 = arith.constant 0 : i32
    %c0_i32_1 = arith.constant 0 : i32
    %c0_i32_2 = arith.constant 0 : i32
    return %c0_i32, %c0_i32_0, %c0_i32_1 : i32, i32, i32
  }
  func.func @transform_1(%arg0: i32) -> (i32, i32) {
    %c0_i32 = arith.constant 0 : i32
    %c0_i32_0 = arith.constant 0 : i32
    %c0_i32_1 = arith.constant 0 : i32
    return %c0_i32, %c0_i32_0 : i32, i32
  }
  func.func @transform_2(%arg0: i32) -> (i32, i32) {
    %c0_i32 = arith.constant 0 : i32
    %c0_i32_0 = arith.constant 0 : i32
    %c0_i32_1 = arith.constant 0 : i32
    return %c0_i32, %c0_i32_0 : i32, i32
  }
  func.func @transform_3(%arg0: i32) -> (i32, i32) {
    %c0_i32 = arith.constant 0 : i32
    %c0_i32_0 = arith.constant 0 : i32
    %c0_i32_1 = arith.constant 0 : i32
    return %c0_i32, %c0_i32_0 : i32, i32
  }
  func.func @transform_4(%arg0: i32) -> (i32, i32, i32) {
    %c0_i32 = arith.constant 0 : i32
    %c0_i32_0 = arith.constant 0 : i32
    %c0_i32_1 = arith.constant 0 : i32
    %c0_i32_2 = arith.constant 0 : i32
    return %c0_i32, %c0_i32_0, %c0_i32_1 : i32, i32, i32
  }
}

</mosaic_0001>

<bundles_post_ra>
// kernel: tpu_custom_call.1
= control target key start
LH: loop header
LB: loop body
LE: loop exit
PB: predicated region body
PF: predicated region fallthrough
CT: control target
= control target key end

     0   :  { %vm22_vm0 = vcmask 261120   ;;  %s502_s19 = smov 32   ;;  %vm18_vm1 = vcmask 519168   ;;  %v503_v4 = vmov 0.0   ;;  %s783_s0 = inlined_call_operand.vmem [shape: f32[2,16,32], index: 0, kind: input, shape index: {}]   ;;  %s784_s1 = inlined_call_operand.vmem [shape: f32[192,64], index: 1, kind: input, shape index: {}]   ;;  %s785_s2 = inlined_call_operand.vmem [shape: f32[192,64], index: 2, kind: input, shape index: {}]   ;;  %s786_s3 = inlined_call_operand.vmem [shape: f32[4,64], index: 3, kind: input, shape index: {}]   ;;  %s787_s4 = inlined_call_operand.hbm [shape: f32[2,16,32], index: 4, kind: output, shape index: {}]  }
   0x1   :  { %v538_v0 = vld [vmem:[%s783_s0 + $0x10] sm:$0xff]  ;;  %v543_v1 = vld [vmem:[%s783_s0] sm:$0xff]  ;;  %v551_v2 = vld [vmem:[%s783_s0 + $0x8] sm:$0xff]  ;;  %19 = vst.msk [vmem:[#allocation2] sm:$0xf] %vm18_vm1, %v503_v4 }
   0x2   :  { %30 = vrot.lane.b32.xlu0 %v538_v0, %s502_s19  ;;  %23 = vst.msk [vmem:[#allocation2 + $0x4] sm:$0xff] %vm22_vm0, %v543_v1  ;;  %v556_v3 = vld [vmem:[%s783_s0 + $0x18] sm:$0xff]  ;;  %24 = vst.msk [vmem:[#allocation2 + $0xc] sm:$0xff] %vm22_vm0, %v551_v2 }
   0x3   :  { %9 = vsyncpa [#allocation5], 0  ;;  %v65_v5 = vld [vmem:[%s784_s1] sm:$0xff]  ;;  %v66_v6 = vld [vmem:[%s784_s1 + $0x8] sm:$0xff]  ;;  %v504_v8 = vmov 0.0|0.0   ;;  %vm36_vm2 = vcmask 523520  }
   0x4   :  { %v67_v7 = vld [vmem:[%s784_s1 + $0x10] sm:$0xff]  ;;  %390 = vmatprep.subr.bf16.mxu0 %v504_v8  ;;  %v391_v9 = vpack.c.bf16 %v66_v6, %v65_v5  ;;  %v68_v10 = vld [vmem:[%s784_s1 + $0x18] sm:$0xff]  ;;  %426 = vmatprep.subr.bf16.mxu1 %v504_v8  ;;  %v69_v12 = vld [vmem:[%s784_s1 + $0x20] sm:$0xff]  ;;  %vm41_vm3 = vcmask 523264   ;;  %s505_s18 = smov 64   ;;  %vm54_vm4 = vcmask 1048064  }
   0x5   :  { %v394_v11 = vpack.c.bf16 %v68_v10, %v67_v7  ;;  %v70_v13 = vld [vmem:[%s784_s1 + $0x28] sm:$0xff]  ;;  %v71_v15 = vld [vmem:[%s784_s1 + $0x30] sm:$0xff]  ;;  %v72_v16 = vld [vmem:[%s784_s1 + $0x38] sm:$0xff] }
   0x6   :  { %32 = vrot.lane.b32.xlu0 %v556_v3, %s502_s19  ;;  %392 = vmatpush1.bf16.msra.mxu0 %v391_v9  ;;  %v397_v14 = vpack.c.bf16 %v70_v13, %v69_v12  ;;  %v400_v17 = vpack.c.bf16 %v72_v16, %v71_v15  ;;  %v73_v18 = vld [vmem:[%s784_s1 + $0x40] sm:$0xff]  ;;  %v74_v19 = vld [vmem:[%s784_s1 + $0x48] sm:$0xff]  ;;  %v75_v21 = vld [vmem:[%s784_s1 + $0x50] sm:$0xff] }
   0x7   :  { %393 = vmatprep.subr.bf16.mxu0 %v504_v8  ;;  %v403_v20 = vpack.c.bf16 %v74_v19, %v73_v18  ;;  %v76_v22 = vld [vmem:[%s784_s1 + $0x58] sm:$0xff]  ;;  %v77_v24 = vld [vmem:[%s784_s1 + $0x60] sm:$0xff]  ;;  %v78_v25 = vld [vmem:[%s784_s1 + $0x68] sm:$0xff] }
   0x8   :  { %v406_v23 = vpack.c.bf16 %v76_v22, %v75_v21  ;;  %v409_v26 = vpack.c.bf16 %v78_v25, %v77_v24  ;;  %v79_v27 = vld [vmem:[%s784_s1 + $0x70] sm:$0xff]  ;;  %v80_v28 = vld [vmem:[%s784_s1 + $0x78] sm:$0xff]  ;;  %v81_v30 = vld [vmem:[%s784_s1 + $0x80] sm:$0xff] }
   0x9   :  { %v412_v29 = vpack.c.bf16 %v80_v28, %v79_v27  ;;  %v82_v31 = vld [vmem:[%s784_s1 + $0x88] sm:$0xff]  ;;  %v83_v33 = vld [vmem:[%s784_s1 + $0x90] sm:$0xff]  ;;  %v84_v34 = vld [vmem:[%s784_s1 + $0x98] sm:$0xff] }
   0xa   :  { %395 = vmatpush1.bf16.msra.mxu0 %v394_v11  ;;  %v415_v32 = vpack.c.bf16 %v82_v31, %v81_v30  ;;  %v418_v35 = vpack.c.bf16 %v84_v34, %v83_v33  ;;  %v85_v36 = vld [vmem:[%s784_s1 + $0xa0] sm:$0xff]  ;;  %v86_v37 = vld [vmem:[%s784_s1 + $0xa8] sm:$0xff]  ;;  %v87_v39 = vld [vmem:[%s784_s1 + $0xb0] sm:$0xff] }
   0xb   :  { %396 = vmatprep.subr.bf16.mxu0 %v504_v8  ;;  %v421_v38 = vpack.c.bf16 %v86_v37, %v85_v36  ;;  %v88_v40 = vld [vmem:[%s784_s1 + $0xb8] sm:$0xff]  ;;  %v212_v56 = vld [vmem:[%s785_s2] sm:$0xff]  ;;  %v213_v57 = vld [vmem:[%s785_s2 + $0x8] sm:$0xff]  ;;  %s507_s1 = smov [#allocation4]  }
   0xc   :  { %v424_v41 = vpack.c.bf16 %v88_v40, %v87_v39  ;;  %v214_v58 = vld [vmem:[%s785_s2 + $0x10] sm:$0xff]  ;;  %v427_v59 = vpack.c.bf16 %v213_v57, %v212_v56  ;;  %v215_v60 = vld [vmem:[%s785_s2 + $0x18] sm:$0xff]  ;;  %v216_v62 = vld [vmem:[%s785_s2 + $0x20] sm:$0xff]  ;;  %s367_s19 = sshll.u32 %s507_s1, 4  ;;  %s368_s19 = int_to_ptr.vmem [resolvable:$true] %s367_s19 }
   0xd   :  { %v430_v61 = vpack.c.bf16 %v215_v60, %v214_v58  ;;  %v217_v63 = vld [vmem:[%s785_s2 + $0x28] sm:$0xff]  ;;  %v218_v5 = vld [vmem:[%s785_s2 + $0x30] sm:$0xff]  ;;  %v219_v6 = vld [vmem:[%s785_s2 + $0x38] sm:$0xff]  ;;  %s478_s20 = scalar_lea.vmem %s368_s19, 512  ;;  %p483_p1 = scmp.lt.s32.totalorder %s368_s19, %s368_s19 }
   0xe   :  { %398 = vmatpush1.bf16.msra.mxu0 %v397_v14  ;;  %428 = vmatpush1.bf16.msra.mxu1 %v427_v59  ;;  %v433_v4 = vpack.c.bf16 %v217_v63, %v216_v62  ;;  %v436_v7 = vpack.c.bf16 %v219_v6, %v218_v5  ;;  %v220_v9 = vld [vmem:[%s785_s2 + $0x40] sm:$0xff]  ;;  %v221_v10 = vld [vmem:[%s785_s2 + $0x48] sm:$0xff]  ;;  %v222_v12 = vld [vmem:[%s785_s2 + $0x50] sm:$0xff]  ;;  %p479_p0 = scmp.ne.s32.totalorder %s368_s19, %s478_s20  ;;  %p484_p2 = scmp.lt.s32.totalorder %s478_s20, %s478_s20 }
   0xf   :  { %399 = vmatprep.subr.bf16.mxu0 %v504_v8  ;;  %429 = vmatprep.subr.bf16.mxu1 %v504_v8  ;;  %v439_v11 = vpack.c.bf16 %v221_v10, %v220_v9  ;;  %v223_v13 = vld [vmem:[%s785_s2 + $0x58] sm:$0xff]  ;;  %v224_v15 = vld [vmem:[%s785_s2 + $0x60] sm:$0xff]  ;;  %v225_v16 = vld [vmem:[%s785_s2 + $0x68] sm:$0xff] }
  0x10   :  { %v442_v14 = vpack.c.bf16 %v223_v13, %v222_v12  ;;  %v226_v18 = vld [vmem:[%s785_s2 + $0x70] sm:$0xff]  ;;  %v227_v19 = vld [vmem:[%s785_s2 + $0x78] sm:$0xff]  ;;  %v228_v21 = vld [vmem:[%s785_s2 + $0x80] sm:$0xff]  ;;  %p485_p3 = por %p484_p2, %p483_p1 }
  0x11   :  { %v229_v22 = vld [vmem:[%s785_s2 + $0x88] sm:$0xff]  ;;  %v230_v24 = vld [vmem:[%s785_s2 + $0x90] sm:$0xff]  ;;  %v231_v25 = vld [vmem:[%s785_s2 + $0x98] sm:$0xff] }
  0x12   :  { %401 = vmatpush1.bf16.msra.mxu0 %v400_v17  ;;  %431 = vmatpush1.bf16.msra.mxu1 %v430_v61  ;;  %v445_v17 = vpack.c.bf16 %v225_v16, %v224_v15  ;;  %v382_v27 = vld [vmem:[%s786_s3] ss:$0 sm:$0xff]  ;;  %v233_v31 = vld [vmem:[%s785_s2 + $0xa8] sm:$0xff]  ;;  %v234_v37 = vld [vmem:[%s785_s2 + $0xb0] sm:$0xff]  ;;  %p486_p4 = pnand %p485_p3, %p479_p0 }
  0x13   :  { %402 = vmatprep.subr.bf16.mxu0 %v504_v8  ;;  %432 = vmatprep.subr.bf16.mxu1 %v504_v8  ;;  %v232_v30 = vld [vmem:[%s785_s2 + $0xa0] sm:$0xff] }
  0x14   :  { %v457_v34 = vpack.c.bf16 %v233_v31, %v232_v30  ;;  %v386_v56 = vld [vmem:[%s786_s3 + $0x2] ss:$0 sm:$0xff]  ;;  %v387_v58 = vld [vmem:[%s786_s3 + $0x3] ss:$0 sm:$0xff] }
  0x16   :  { %404 = vmatpush1.bf16.msra.mxu0 %v403_v20  ;;  %434 = vmatpush1.bf16.msra.mxu1 %v433_v4  ;;  %v448_v20 = vpack.c.bf16 %v227_v19, %v226_v18 }
  0x17   :  { %405 = vmatprep.subr.bf16.mxu0 %v504_v8  ;;  %435 = vmatprep.subr.bf16.mxu1 %v504_v8 }
  0x1a   :  { %407 = vmatpush1.bf16.msra.mxu0 %v406_v23  ;;  %437 = vmatpush1.bf16.msra.mxu1 %v436_v7  ;;  %v451_v23 = vpack.c.bf16 %v229_v22, %v228_v21 }
  0x1b   :  { %408 = vmatprep.subr.bf16.mxu0 %v504_v8  ;;  %438 = vmatprep.subr.bf16.mxu1 %v504_v8 }
  0x1e   :  { %410 = vmatpush1.bf16.msra.mxu0 %v409_v26  ;;  %440 = vmatpush1.bf16.msra.mxu1 %v439_v11  ;;  %v454_v26 = vpack.c.bf16 %v231_v25, %v230_v24 }
  0x1f   :  { %411 = vmatprep.subr.bf16.mxu0 %v504_v8  ;;  %441 = vmatprep.subr.bf16.mxu1 %v504_v8 }
  0x22   :  { %413 = vmatpush1.bf16.msra.mxu0 %v412_v29  ;;  %443 = vmatpush1.bf16.msra.mxu1 %v442_v14  ;;  %v383_v29 = vld [vmem:[%s786_s3 + $0x1] ss:$0 sm:$0xff]  ;;  %s506_s3 = smov 96  }
  0x23   :  { %414 = vmatprep.subr.bf16.mxu0 %v504_v8  ;;  %444 = vmatprep.subr.bf16.mxu1 %v504_v8 }
  0x26   :  { %416 = vmatpush1.bf16.msra.mxu0 %v415_v32  ;;  %446 = vmatpush1.bf16.msra.mxu1 %v445_v17 }
  0x27   :  { %417 = vmatprep.subr.bf16.mxu0 %v504_v8  ;;  %447 = vmatprep.subr.bf16.mxu1 %v504_v8 }
  0x2a   :  { %419 = vmatpush1.bf16.msra.mxu0 %v418_v35  ;;  %449 = vmatpush1.bf16.msra.mxu1 %v448_v20 }
  0x2b   :  { %420 = vmatprep.subr.bf16.mxu0 %v504_v8  ;;  %450 = vmatprep.subr.bf16.mxu1 %v504_v8 }
  0x2e   :  { %422 = vmatpush1.bf16.msra.mxu0 %v421_v38  ;;  %452 = vmatpush1.bf16.msra.mxu1 %v451_v23  ;;  %v235_v38 = vld [vmem:[%s785_s2 + $0xb8] sm:$0xff] }
  0x2f   :  { %423 = vmatprep.subr.bf16.mxu0 %v504_v8  ;;  %453 = vmatprep.subr.bf16.mxu1 %v504_v8 }
  0x32   :  { %425 = vmatpush1.bf16.msra.mxu0 %v424_v41  ;;  %455 = vmatpush1.bf16.msra.mxu1 %v454_v26 }
  0x33   :  { %456 = vmatprep.subr.bf16.mxu1 %v504_v8 }
  0x36   :  { %458 = vmatpush1.bf16.msra.mxu1 %v457_v34 }
  0x37   :  { %459 = vmatprep.subr.bf16.mxu1 %v504_v8 }
  0x74   :  { %v31_v42 = vpop.permute.xlu0 %30 }
  0x75   :  { %37 = vst.msk [vmem:[#allocation2 + $0x4] sm:$0xff] %vm36_vm2, %v31_v42  ;;  %v460_v42 = vpack.c.bf16 %v235_v38, %v234_v37 }
  0x77   :  { %461 = vmatpush1.bf16.msra.mxu1 %v460_v42 }
  0x78   :  { %v33_v43 = vpop.permute.xlu0 %32 }
  0x79   :  { %38 = vst.msk [vmem:[#allocation2 + $0xc] sm:$0xff] %vm36_vm2, %v33_v43 }
  0x7c   :  { %v44_v44 = vld [vmem:[#allocation2 + $0x2] sm:$0xff] }
  0x7d   :  { %v57_v45 = vld [vmem:[#allocation2 + $0x4] sm:$0xff]  ;;  %48 = vrot.lane.b32.xlu1 %v44_v44, %s505_s18 }
  0x7e   :  { %v39_v46 = vld [vmem:[#allocation2] sm:$0xff]  ;;  %59 = vst.msk [vmem:[#allocation3 + $0x8] sm:$0xff] %vm41_vm3, %v57_v45 }
  0x7f   :  { %42 = vst.msk [vmem:[#allocation3] sm:$0xff] %vm41_vm3, %v39_v46 }
  0x80   :  { %v58_v47 = vld [vmem:[#allocation2 + $0xc] sm:$0xff] }
  0x81   :  { %v45_v48 = vld [vmem:[#allocation2 + $0xa] sm:$0xff]  ;;  %60 = vst.msk [vmem:[#allocation3 + $0x18] sm:$0xff] %vm41_vm3, %v58_v47 }
  0x82   :  { %v40_v49 = vld [vmem:[#allocation2 + $0x8] sm:$0xff]  ;;  %50 = vrot.lane.b32.xlu1 %v45_v48, %s505_s18 }
  0x83   :  { %43 = vst.msk [vmem:[#allocation3 + $0x10] sm:$0xff] %vm41_vm3, %v40_v49 }
  0x85   :  { %v62_v50 = vld [vmem:[#allocation3 + $0x8] sm:$0xff] }
  0x86   :  { %380 = vmatprep.mubr.msk.f32.mxu0 %vm41_vm3, %v62_v50 }
  0x88   :  { %v64_v54 = vld [vmem:[#allocation3 + $0x18] sm:$0xff] }
  0xef   :  { %v49_v51 = vpop.permute.xlu1 %48 }
  0xf0   :  { %55 = vst.msk [vmem:[#allocation3] sm:$0xff] %vm54_vm4, %v49_v51 }
  0xf4   :  { %v51_v52 = vpop.permute.xlu1 %50 }
  0xf5   :  { %56 = vst.msk [vmem:[#allocation3 + $0x10] sm:$0xff] %vm54_vm4, %v51_v52 }
  0xf7   :  { %v61_v53 = vld [vmem:[#allocation3] sm:$0xff] }
  0xf8   :  { %160 = vmatmul.mubr.f32.vlgmr.msra.gmra.mrb[0].mxu0 %v61_v53 }
  0xf9   :  { %381 = vmatprep.mubr.msk.f32.mxu0 %vm41_vm3, %v64_v54 }
  0xfc   :  { %v63_v55 = vld [vmem:[#allocation3 + $0x10] sm:$0xff] }
  0xfd   :  { %165 = vmatmul.mubr.f32.gmra.mrb[2].mxu0 %v63_v55 }
 0x1cb   :  { %v161_v28 = vpop.f32.mrb[0].mxu0 }
 0x1cc   :  { %v175_v32 = vmul.f32 %v382_v27, %v161_v28  ;;  %v163_v33 = vpop.f32.mrb[1].mxu0 }
 0x1ce   :  { %v182_v35 = vadd.f32 %v383_v29, %v175_v32 }
 0x1d0   :  { %v166_v36 = vpop.f32.mrb[2].mxu0  ;;  %v184_v39 = vmax.f32 %v182_v35, 0.0 }
 0x1d1   :  { %v176_v40 = vmul.f32 %v382_v27, %v166_v36  ;;  %v168_v41 = vpop.f32.mrb[3].mxu0 }
 0x1d2   :  { %186 = vst.msk [vmem:[#allocation2 + $0x4] sm:$0xff] %vm41_vm3, %v184_v39 }
 0x1d3   :  { %v183_v43 = vadd.f32 %v383_v29, %v176_v40 }
 0x1d5   :  { %v185_v44 = vmax.f32 %v183_v43, 0.0 }
 0x1d7   :  { %187 = vst.msk [vmem:[#allocation2 + $0xc] sm:$0xff] %vm41_vm3, %v185_v44 }
 0x1d9   :  { %v192_v8 = vld [vmem:[#allocation2 + $0x2] sm:$0xff] }
 0x1da   :  { %v204_v45 = vld [vmem:[#allocation2 + $0x4] sm:$0xff]  ;;  %196 = vrot.lane.b32.xlu0 %v192_v8, %s505_s18 }
 0x1db   :  { %v188_v46 = vld [vmem:[#allocation2] sm:$0xff]  ;;  %206 = vst.msk [vmem:[#allocation3 + $0x8] sm:$0xff] %vm41_vm3, %v204_v45 }
 0x1dc   :  { %190 = vst.msk [vmem:[#allocation3] sm:$0xff] %vm41_vm3, %v188_v46 }
 0x1de   :  { %v193_v47 = vld [vmem:[#allocation2 + $0xa] sm:$0xff] }
 0x1df   :  { %v189_v48 = vld [vmem:[#allocation2 + $0x8] sm:$0xff]  ;;  %198 = vrot.lane.b32.xlu1 %v193_v47, %s505_s18 }
 0x1e0   :  { %v205_v49 = vld [vmem:[#allocation2 + $0xc] sm:$0xff]  ;;  %191 = vst.msk [vmem:[#allocation3 + $0x10] sm:$0xff] %vm41_vm3, %v189_v48 }
 0x1e1   :  { %207 = vst.msk [vmem:[#allocation3 + $0x18] sm:$0xff] %vm41_vm3, %v205_v49 }
 0x1e2   :  { %v209_v50 = vld [vmem:[#allocation3 + $0x8] sm:$0xff] }
 0x1e3   :  { %384 = vmatprep.mubr.msk.f32.mxu1 %vm41_vm3, %v209_v50 }
 0x1e8   :  { %v211_v54 = vld [vmem:[#allocation3 + $0x18] sm:$0xff] }
 0x24c   :  { %v197_v51 = vpop.permute.xlu0 %196 }
 0x24d   :  { %202 = vst.msk [vmem:[#allocation3] sm:$0xff] %vm54_vm4, %v197_v51 }
 0x251   :  { %v199_v52 = vpop.permute.xlu1 %198 }
 0x252   :  { %203 = vst.msk [vmem:[#allocation3 + $0x10] sm:$0xff] %vm54_vm4, %v199_v52 }
 0x254   :  { %v208_v53 = vld [vmem:[#allocation3] sm:$0xff] }
 0x255   :  { %307 = vmatmul.mubr.f32.vlgmr.msra.gmra.mrb[0].mxu1 %v208_v53 }
 0x256   :  { %385 = vmatprep.mubr.msk.f32.mxu1 %vm41_vm3, %v211_v54 }
 0x259   :  { %v210_v55 = vld [vmem:[#allocation3 + $0x10] sm:$0xff] }
 0x25a   :  { %312 = vmatmul.mubr.f32.gmra.mrb[2].mxu1 %v210_v55 }
 0x328   :  { %v308_v57 = vpop.f32.mrb[0].mxu1 }
 0x329   :  { %v322_v59 = vmul.f32 %v386_v56, %v308_v57  ;;  %v310_v60 = vpop.f32.mrb[1].mxu1 }
 0x32b   :  { %v329_v61 = vadd.f32 %v387_v58, %v322_v59 }
 0x32d   :  { %v313_v62 = vpop.f32.mrb[2].mxu1  ;;  %v331_v63 = vmax.f32 %v329_v61, 0.0 }
 0x32e   :  { %v323_v4 = vmul.f32 %v386_v56, %v313_v62  ;;  %v315_v5 = vpop.f32.mrb[3].mxu1 }
 0x32f   :  { %v388_v6 = vmul.f32 -1.442695, %v331_v63 }
 0x330   :  { %v330_v7 = vadd.f32 %v387_v58, %v323_v4 }
 0x331   :  { %470 = vpow2.f32 %v388_v6 }
 0x332   :  { %v332_v9 = vmax.f32 %v330_v7, 0.0 }
 0x334   :  { %v389_v10 = vmul.f32 -1.442695, %v332_v9 }
 0x336   :  { %472 = vpow2.f32 %v389_v10 }
 0x33b   :  { %v471_v11 = vpop.eup %470 }
 0x33c   :  { %v339_v12 = vadd.f32 1.0, %v471_v11 }
 0x33e   :  { %474 = vrcp.f32 %v339_v12 }
 0x340   :  { %v473_v13 = vpop.eup %472 }
 0x341   :  { %v340_v14 = vadd.f32 1.0, %v473_v13 }
 0x343   :  { %476 = vrcp.f32 %v340_v14 }
 0x348   :  { %v475_v15 = vpop.eup %474 }
 0x349   :  { %351 = vrot.lane.b32.xlu0 %v475_v15, %s506_s3  ;;  %v345_v16 = vmul.f32 %v475_v15, %v543_v1 }
 0x34b   :  { %347 = vst.msk [vmem:[#allocation4] sm:$0xff] %vm22_vm0, %v345_v16 }
 0x34d   :  { %v477_v17 = vpop.eup %476 }
 0x34e   :  { %353 = vrot.lane.b32.xlu1 %v477_v17, %s506_s3  ;;  %v346_v18 = vmul.f32 %v477_v17, %v551_v2 }
 0x350   :  { %348 = vst.msk [vmem:[#allocation4 + $0x8] sm:$0xff] %vm22_vm0, %v346_v18 }
 0x3bb   :  { %v352_v19 = vpop.permute.xlu0 %351 }
 0x3bc   :  { %v357_v20 = vmul.f32 %v538_v0, %v352_v19 }
 0x3be   :  { %360 = vst.msk [vmem:[#allocation4 + $0x10] sm:$0xff] %vm22_vm0, %v357_v20 }
 0x3c0   :  { %v354_v21 = vpop.permute.xlu1 %353 }
 0x3c1   :  { %v358_v22 = vmul.f32 %v556_v3, %v354_v21 }
 0x3c3   :  { %361 = vst.msk [vmem:[#allocation4 + $0x18] sm:$0xff] %vm22_vm0, %v358_v22 }
 0x3c4   :  { %489 = shalt.err (!%p486_p4)
}
 0x3c5   :  { %s490_s23 = scalar_lea.hbm %s787_s4, 512 }
 0x3c6   :  { %p491_p5 = scmp.ne.s32.totalorder %s787_s4, %s490_s23  ;;  %p494_p6 = scmp.lt.u32.totalorder %s490_s23, %s787_s4 }
 0x3c8   :  { %p496_p7 = pnand %p494_p6, %p491_p5 }
 0x3ca   :  { %499 = shalt.err (!%p496_p7)
}
 0x3cb   :  { %s508_s28 = smov 128   ;;  %s509_s29 = smov 8  }
 0x3cc   :  { %373 = dma.vmem_to_hbm [thread:$0]  %s368_s19, 512, %s787_s4, [#allocation5], %s508_s28, %s508_s28, %s509_s29  }
 0x3cd   :  { %500 = dma.done.wait [#allocation5], 512  }
 0x3ce   :  { %501 = vsyncadd [#allocation5], 4294966784 }
 0x3cf   :  { %377 = vsyncpa [#allocation5], 1 }

</bundles_post_ra>
